<compile_context>
chip_gen: v5e
topology: v5e:2x2
jax: 0.10.0
libtpu: 0.0.40
codegen_flags: <defaults>
</compile_context>

<pallas_src>
import functools

import jax
import jax.numpy as jnp
from jax.experimental import pallas as pl
from jax.experimental.pallas import tpu as pltpu

MIN_RATING = 0.5
MAX_RATING = 5.0
_LANE = 128
_SUBLANE = 8


def _rating_kernel_bias(ue_ref, me_ref, bias_ref, o_ref):
    # ue/me: (D, tb) lane-dense tiles; bias/o: (1, tb) lane-dense tiles.
    dot = jnp.sum(ue_ref[...] * me_ref[...], axis=0, keepdims=True)   # sublane reduce (XLU)
    o_ref[...] = jnp.clip(dot + bias_ref[...], MIN_RATING, MAX_RATING)


def _rating_kernel_nobias(ue_ref, me_ref, o_ref):
    dot = jnp.sum(ue_ref[...] * me_ref[...], axis=0, keepdims=True)
    o_ref[...] = jnp.clip(dot, MIN_RATING, MAX_RATING)


@functools.partial(jax.jit, static_argnames=("include_bias", "block_b"))
def neural_inner_product_forward(user_ids, movie_ids, params,
                                 include_bias=True, block_b=32768):
    user_emb = params["user_embedding"]     # (n_users, D)
    movie_emb = params["movie_embedding"]   # (n_movies, D)
    dtype = user_emb.dtype

    B = user_ids.shape[0]
    D = user_emb.shape[1]

    # ---- tile sizing -------------------------------------------------------
    lanes = pl.cdiv(B, _LANE) * _LANE                     # lane-padded batch
    block_b = max(_LANE, min(int(block_b), lanes))
    block_b = (block_b // _LANE) * _LANE
    # v7x has 2 TensorCores: a single-step grid would idle one core, so split
    # into >= 2 "parallel" steps whenever the batch is big enough.
    if pl.cdiv(B, block_b) < 2 and lanes >= 2 * _LANE:
        block_b = pl.cdiv(lanes // 2, _LANE) * _LANE
    grid_n = pl.cdiv(B, block_b)
    Bp = grid_n * block_b
    pad = Bp - B

    # ---- XLA glue: gather straight into the lane-dense (D, Bp) layout ------
    # Pad the id vectors (cheap) instead of the gathered slabs.
    uid = jnp.pad(user_ids, (0, pad)) if pad else user_ids
    mid = jnp.pad(movie_ids, (0, pad)) if pad else movie_ids

    # Transpose the (small) tables once, gather along axis=1: produces the
    # (D, Bp) slabs directly, with no per-batch-element transpose pass.
    ue_t = jnp.take(user_emb.T, uid, axis=1)              # (D, Bp)
    me_t = jnp.take(movie_emb.T, mid, axis=1)             # (D, Bp)

    # ---- VMEM budget (double-buffered streams) ------------------------------
    d_rows = pl.cdiv(D, _SUBLANE) * _SUBLANE              # f32 sublane padding
    rows_per_step = 2 * d_rows + _SUBLANE + (_SUBLANE if include_bias else 0)
    step_bytes = 4 * block_b * rows_per_step
    vmem_limit = int(min(2 * step_bytes + (4 << 20), 48 << 20))

    common = dict(
        out_shape=jax.ShapeDtypeStruct((1, Bp), dtype),
        compiler_params=pltpu.CompilerParams(
            dimension_semantics=("parallel",),
            vmem_limit_bytes=vmem_limit),
    )
    emb_spec = pl.BlockSpec((D, block_b), lambda i: (0, i))
    row_spec = pl.BlockSpec((1, block_b), lambda i: (0, i))

    if include_bias:
        bias = (jnp.take(params["user_biases"][:, 0], uid, axis=0)
                + jnp.take(params["movie_biases"][:, 0], mid, axis=0))
        bias = bias[None, :].astype(dtype)                # (1, Bp)
        out = pl.pallas_call(
            _rating_kernel_bias,
            grid_spec=pltpu.PrefetchScalarGridSpec(
                num_scalar_prefetch=0, grid=(grid_n,),
                in_specs=[emb_spec, emb_spec, row_spec],
                out_specs=row_spec),
            **common,
        )(ue_t, me_t, bias)
    else:
        # Specialized no-bias kernel: no zeros materialization, no bias DMA stream.
        out = pl.pallas_call(
            _rating_kernel_nobias,
            grid_spec=pltpu.PrefetchScalarGridSpec(
                num_scalar_prefetch=0, grid=(grid_n,),
                in_specs=[emb_spec, emb_spec],
                out_specs=row_spec),
            **common,
        )(ue_t, me_t)

    return out[0, :B]   # (B,), matches the torch output shape


def _reference_forward(user_ids, movie_ids, params, include_bias=True):
    ue = jnp.take(params["user_embedding"], user_ids, axis=0)
    me = jnp.take(params["movie_embedding"], movie_ids, axis=0)
    pred = jnp.sum(ue * me, axis=1)
    if include_bias:
        pred = pred + jnp.take(params["user_biases"], user_ids, axis=0)[:, 0]
        pred = pred + jnp.take(params["movie_biases"], movie_ids, axis=0)[:, 0]
    return jnp.clip(pred, MIN_RATING, MAX_RATING)


if __name__ == "__main__":
    n_users, n_movies, embedding_dim = 32, 48, 10

    key = jax.random.PRNGKey(0)
    k_ue, k_me, k_ub, k_mb, k_id = jax.random.split(key, 5)

    # Deterministic synthetic parameters (nn.Embedding ~ N(0,1) init).
    params = {
        "user_embedding": jax.random.normal(k_ue, (n_users, embedding_dim), jnp.float32),
        "movie_embedding": jax.random.normal(k_me, (n_movies, embedding_dim), jnp.float32),
        "user_biases": jax.random.normal(k_ub, (n_users, 1), jnp.float32),
        "movie_biases": jax.random.normal(k_mb, (n_movies, 1), jnp.float32),
    }

    # batch=16: single-tile path; batch=300: multi-step grid + id padding path.
    for batch in (16, 300):
        k_u = jax.random.fold_in(k_id, 2 * batch)
        k_m = jax.random.fold_in(k_id, 2 * batch + 1)
        user_ids = jax.random.randint(k_u, (batch,), 0, n_users, dtype=jnp.int32)
        movie_ids = jax.random.randint(k_m, (batch,), 0, n_movies, dtype=jnp.int32)

        for include_bias in (True, False):
            out = neural_inner_product_forward(user_ids, movie_ids, params,
                                               include_bias=include_bias)
            out = jax.block_until_ready(out)
            ref = _reference_forward(user_ids, movie_ids, params,
                                     include_bias=include_bias)
            assert out.shape == (batch,)
            assert jnp.allclose(out, ref, atol=1e-5, rtol=1e-5), (batch, include_bias, out, ref)

    print("KERNEL_OK")
</pallas_src>

<mosaic_0001>
module attributes {stable_mosaic.version = 11 : i64} {
  func.func @_rating_kernel_bias(%arg0: i32, %arg1: memref<10x128xf32, #tpu.memory_space<vmem>>, %arg2: memref<10x128xf32, #tpu.memory_space<vmem>>, %arg3: memref<1x128xf32, #tpu.memory_space<vmem>>, %arg4: memref<1x128xf32, #tpu.memory_space<vmem>>) attributes {dimension_semantics = [#tpu.dimension_semantics<parallel>], iteration_bounds = array<i64: 1>, scalar_prefetch = 0 : i64, scratch_operands = 0 : i64, tpu.core_type = #tpu.core_type<tc>, window_params = [{transform_indices = @transform_0, window_bounds = array<i64: 10, 128>}, {transform_indices = @transform_1, window_bounds = array<i64: 10, 128>}, {transform_indices = @transform_2, window_bounds = array<i64: 1, 128>}, {transform_indices = @transform_3, window_bounds = array<i64: 1, 128>}]} {
    %c0 = arith.constant 0 : index
    %c0_0 = arith.constant 0 : index
    %0 = vector.load %arg1[%c0, %c0_0] : memref<10x128xf32, #tpu.memory_space<vmem>>, vector<10x128xf32>
    %c0_1 = arith.constant 0 : index
    %c0_2 = arith.constant 0 : index
    %1 = vector.load %arg2[%c0_1, %c0_2] : memref<10x128xf32, #tpu.memory_space<vmem>>, vector<10x128xf32>
    %2 = arith.mulf %0, %1 : vector<10x128xf32>
    %cst = arith.constant dense<0.000000e+00> : vector<128xf32>
    %3 = vector.multi_reduction <add>, %2, %cst [0] : vector<10x128xf32> to vector<128xf32>
    %4 = vector.shape_cast %3 : vector<128xf32> to vector<1x128xf32>
    %c0_3 = arith.constant 0 : index
    %c0_4 = arith.constant 0 : index
    %5 = vector.load %arg3[%c0_3, %c0_4] : memref<1x128xf32, #tpu.memory_space<vmem>>, vector<1x128xf32>
    %6 = arith.addf %4, %5 : vector<1x128xf32>
    %cst_5 = arith.constant 5.000000e-01 : f32
    %cst_6 = arith.constant 5.000000e+00 : f32
    %7 = vector.broadcast %cst_5 : f32 to vector<1x128xf32>
    %8 = arith.maximumf %7, %6 : vector<1x128xf32>
    %9 = vector.broadcast %cst_6 : f32 to vector<1x128xf32>
    %10 = arith.minimumf %9, %8 : vector<1x128xf32>
    %c0_7 = arith.constant 0 : index
    %c0_8 = arith.constant 0 : index
    %11 = vector.load %arg4[%c0_7, %c0_8] : memref<1x128xf32, #tpu.memory_space<vmem>>, vector<1x128xf32>
    tpu.vector_store %arg4[%c0_7, %c0_8], %10 {strides = array<i32>} : memref<1x128xf32, #tpu.memory_space<vmem>>, vector<1x128xf32>,
    return
  }
  func.func @transform_0(%arg0: i32) -> (i32, i32) {
    %c0_i32 = arith.constant 0 : i32
    %c0_i32_0 = arith.constant 0 : i32
    return %c0_i32, %arg0 : i32, i32
  }
  func.func @transform_1(%arg0: i32) -> (i32, i32) {
    %c0_i32 = arith.constant 0 : i32
    %c0_i32_0 = arith.constant 0 : i32
    return %c0_i32, %arg0 : i32, i32
  }
  func.func @transform_2(%arg0: i32) -> (i32, i32) {
    %c0_i32 = arith.constant 0 : i32
    %c0_i32_0 = arith.constant 0 : i32
    return %c0_i32, %arg0 : i32, i32
  }
  func.func @transform_3(%arg0: i32) -> (i32, i32) {
    %c0_i32 = arith.constant 0 : i32
    %c0_i32_0 = arith.constant 0 : i32
    return %c0_i32, %arg0 : i32, i32
  }
}

</mosaic_0001>

<bundles_post_ra>
// kernel: neural_inner_product_forward.1
= control target key start
LH: loop header
LB: loop body
LE: loop exit
PB: predicated region body
PF: predicated region fallthrough
CT: control target
= control target key end

     0   :  { %vm20_vm0 = vcmask 1041408   ;;  %s76_s0 = inlined_call_operand.vmem [shape: f32[10,128], index: 0, kind: input, shape index: {}]   ;;  %s77_s1 = inlined_call_operand.vmem [shape: f32[10,128], index: 1, kind: input, shape index: {}]   ;;  %s78_s2 = inlined_call_operand.vmem [shape: f32[1,128], index: 2, kind: input, shape index: {}]   ;;  %s79_s3 = inlined_call_operand.vmem [shape: f32[1,128], index: 3, kind: output, shape index: {}]  }
   0x1   :  { %v14_v0 = vld [vmem:[%s76_s0] sm:$0xff]  ;;  %v15_v1 = vld [vmem:[%s76_s0 + $0x8] sm:$0x3] }
   0x2   :  { %v16_v2 = vld [vmem:[%s77_s1] sm:$0xff]  ;;  %v17_v3 = vld [vmem:[%s77_s1 + $0x8] sm:$0x3] }
   0x3   :  { %v18_v4 = vmul.f32 %v16_v2, %v14_v0  ;;  %v19_v5 = vmul.f32 %v17_v3, %v15_v1  ;;  %v29_v13 = vld [vmem:[%s78_s2] sm:$0x1] }
   0x5   :  { %v21_v6 = vsel %vm20_vm0, %v19_v5, 0.0 }
   0x6   :  { %v22_v7 = vadd.f32 %v21_v6, %v18_v4 }
   0x8   :  { %v23_v8 = vrot.slane %v22_v7, 4 }
   0xa   :  { %v24_v9 = vadd.f32 %v23_v8, %v22_v7 }
   0xc   :  { %v25_v10 = vrot.slane %v24_v9, 2 }
   0xe   :  { %v26_v11 = vadd.f32 %v25_v10, %v24_v9 }
  0x10   :  { %v27_v12 = vrot.slane %v26_v11, 1 }
  0x12   :  { %v28_v14 = vadd.f32 %v27_v12, %v26_v11 }
  0x14   :  { %v30_v15 = vadd.f32 %v29_v13, %v28_v14 }
  0x16   :  { %v31_v16 = vmax.f32 %v30_v15, 0.5 }
  0x18   :  { %v32_v17 = vmin.f32 %v31_v16, 5.0 }
  0x1a   :  { %33 = vst [vmem:[%s79_s3] sm:$0x1] %v32_v17 }

</bundles_post_ra>
